<compile_context>
chip_gen: v5e
topology: v5e:2x2
jax: 0.10.0
libtpu: 0.0.40
codegen_flags: <defaults>
</compile_context>

<pallas_src>
import functools
import math

import jax
import jax.numpy as jnp
from jax.experimental import pallas as pl
from jax.experimental.pallas import tpu as pltpu


def _round_up(x, m):
    return ((x + m - 1) // m) * m


def _leaky_relu(x, slope):
    return jnp.where(x >= 0, x, slope * x)


def _vmem_limit(block_bytes, scratch_bytes=0):
    # Double-buffered pipeline blocks + persistent scratch + margin for
    # compiler-managed temporaries; clamp to [24 MiB, 40 MiB]: above the
    # 16/32 MiB scoped defaults, comfortable headroom under v7x's 64 MiB.
    need = 2 * block_bytes + scratch_bytes
    return int(min(max(2 * need, 24 * 1024 * 1024), 40 * 1024 * 1024))


# ---------------------------------------------------------------------------
# Single GraphConvolution layer: out = (adj @ x) @ W [+ bias] [, LeakyReLU]
# (re-associated form of adj @ (x @ W) -- identical math, fewer FLOPs when
#  C_out > C_in, and no per-row-tile recompute of x @ W)
# ---------------------------------------------------------------------------
def _gcn_layer_kernel(*refs, has_bias, negative_slope):
    if has_bias:
        x_ref, adj_ref, w_ref, b_ref, o_ref = refs
    else:
        x_ref, adj_ref, w_ref, o_ref = refs
        b_ref = None
    # bf16 x bf16 -> f32 accumulate on the MXU.
    t = jnp.dot(adj_ref[...], x_ref[...], preferred_element_type=jnp.float32)
    out = jnp.dot(t.astype(jnp.bfloat16), w_ref[...],
                  preferred_element_type=jnp.float32)
    if b_ref is not None:
        out = out + b_ref[...]
    if negative_slope is not None:
        out = _leaky_relu(out, negative_slope)
    o_ref[...] = out.astype(o_ref.dtype)


def graph_convolution(x, adj, weight, bias=None, *, negative_slope=None):
    """Standalone GCN layer: adj @ (x @ weight) [+ bias], optional LeakyReLU.

    x: (N, C_in), adj: (N, N) shared across the batch, weight: (C_in, C_out).
    For hot loops prefer pre-padding/casting operands (see gcn_head()).
    """
    N, C_in = x.shape
    C_out = weight.shape[1]
    out_dtype = x.dtype

    # Lane/sublane-aligned zero padding (padded rows/cols are inert).
    Np = _round_up(N, 128)
    tn = Np if Np <= 512 else 256      # row-tile large graphs ("parallel")
    Np = _round_up(Np, tn)
    Cin_p = _round_up(C_in, 128)
    Cout_p = _round_up(C_out, 128)

    xp = jnp.pad(x.astype(jnp.bfloat16), ((0, Np - N), (0, Cin_p - C_in)))
    adjp = jnp.pad(adj.astype(jnp.bfloat16), ((0, Np - N), (0, Np - N)))
    wp = jnp.pad(weight.astype(jnp.bfloat16),
                 ((0, Cin_p - C_in), (0, Cout_p - C_out)))

    in_specs = [
        pl.BlockSpec((Np, Cin_p), lambda i: (0, 0)),      # full x
        pl.BlockSpec((tn, Np), lambda i: (i, 0)),         # adj row tile
        pl.BlockSpec((Cin_p, Cout_p), lambda i: (0, 0)),  # full weight
    ]
    args = [xp, adjp, wp]
    has_bias = bias is not None
    if has_bias:
        bp = jnp.pad(bias.reshape(1, C_out).astype(jnp.float32),
                     ((0, 0), (0, Cout_p - C_out)))
        in_specs.append(pl.BlockSpec((1, Cout_p), lambda i: (0, 0)))
        args.append(bp)

    out_isz = jnp.dtype(out_dtype).itemsize
    block_bytes = (2 * (Np * Cin_p + tn * Np + Cin_p * Cout_p)
                   + out_isz * tn * Cout_p
                   + (4 * Cout_p if has_bias else 0))
    scratch_bytes = 4 * tn * (Cin_p + Cout_p)   # f32 intermediates in-kernel
    flops = 2 * (Np * Np * Cin_p + Np * Cin_p * Cout_p)
    bytes_accessed = (2 * (Np * Cin_p + Np * Np + Cin_p * Cout_p)
                      + out_isz * Np * Cout_p)

    out = pl.pallas_call(
        functools.partial(_gcn_layer_kernel, has_bias=has_bias,
                          negative_slope=negative_slope),
        out_shape=jax.ShapeDtypeStruct((Np, Cout_p), out_dtype),
        grid_spec=pltpu.PrefetchScalarGridSpec(
            num_scalar_prefetch=0,
            grid=(Np // tn,),
            in_specs=in_specs,
            out_specs=pl.BlockSpec((tn, Cout_p), lambda i: (i, 0)),
        ),
        compiler_params=pltpu.CompilerParams(
            dimension_semantics=("parallel",),
            vmem_limit_bytes=_vmem_limit(block_bytes, scratch_bytes)),
        cost_estimate=pl.CostEstimate(flops=flops, transcendentals=0,
                                      bytes_accessed=bytes_accessed),
    )(*args)
    return out[:N, :C_out]


# ---------------------------------------------------------------------------
# Fused GCNResnet head: gc1 -> LeakyReLU -> gc2 -> transpose -> feature matmul
# D-reduction-tiled, with a "parallel" split for v7x megacore.
# ---------------------------------------------------------------------------
def prepare_gcn_head(inp, adj, w1, w2):
    """Pad + cast the static GCN-head operands ONCE; cache & reuse per step."""
    N, C0 = inp.shape
    assert adj.shape == (N, N)
    C1 = w1.shape[1]
    assert w1.shape == (C0, C1)
    D = w2.shape[1]
    assert w2.shape == (C1, D)
    Np, C0p, C1p, Dp = (_round_up(v, 128) for v in (N, C0, C1, D))
    return {
        "inp": jnp.pad(inp.astype(jnp.bfloat16), ((0, Np - N), (0, C0p - C0))),
        "adj": jnp.pad(adj.astype(jnp.bfloat16), ((0, Np - N), (0, Np - N))),
        "w1": jnp.pad(w1.astype(jnp.bfloat16), ((0, C0p - C0), (0, C1p - C1))),
        "w2": jnp.pad(w2.astype(jnp.bfloat16), ((0, C1p - C1), (0, Dp - D))),
        "dims": (N, C0, C1, D),
    }


def _gcn_head_kernel(feat_ref, inp_ref, adj_ref, w1_ref, w2_ref, o_ref,
                     t2_ref, acc_ref, *, negative_slope, n_dsteps):
    j = pl.program_id(1)

    @pl.when(j == 0)
    def _():
        # gc1, re-associated:  x1 = LeakyReLU((A @ inp) @ W1)
        t1 = jnp.dot(adj_ref[...], inp_ref[...],
                     preferred_element_type=jnp.float32)
        x1 = jnp.dot(t1.astype(jnp.bfloat16), w1_ref[...],
                     preferred_element_type=jnp.float32)
        x1 = _leaky_relu(x1, negative_slope)
        # gc2 left half, re-associated:  t2 = A @ x1   (reused by every D tile)
        t2_ref[...] = jnp.dot(adj_ref[...], x1.astype(jnp.bfloat16),
                              preferred_element_type=jnp.float32
                              ).astype(jnp.bfloat16)
        acc_ref[...] = jnp.zeros_like(acc_ref)

    # x2[:, tile] = t2 @ W2[:, tile]
    x2_t = jnp.dot(t2_ref[...], w2_ref[...],
                   preferred_element_type=jnp.float32)
    # acc += feature[:, tile] @ x2[:, tile].T — contract dim 1 with dim 1 so
    # the MXU takes the transposed RHS directly (no XLU transpose of x2).
    acc_ref[...] += jax.lax.dot_general(
        feat_ref[...], x2_t.astype(jnp.bfloat16),
        dimension_numbers=(((1,), (1,)), ((), ())),
        preferred_element_type=jnp.float32)

    @pl.when(j == n_dsteps - 1)
    def _():
        o_ref[0] = acc_ref[...].astype(o_ref.dtype)


def gcn_head(feature, prepared, *, negative_slope=0.2, d_tile=None,
             num_splits=None):
    """Fused GCNResnet head: feature @ (A @ lrelu((A @ inp) @ W1) @ W2).T ."""
    N, C0, C1, D = prepared["dims"]
    inpp, adjp, w1p, w2p = (prepared[k] for k in ("inp", "adj", "w1", "w2"))
    Np, C0p = inpp.shape
    C1p, Dp = w2p.shape
    B = feature.shape[0]
    assert feature.shape[1] == D
    out_dtype = feature.dtype
    Bp = _round_up(B, 8)

    # Only the per-step activation (feature) is padded/cast each call.
    featp = jnp.pad(feature.astype(jnp.bfloat16),
                    ((0, Bp - B), (0, Dp - D)))

    if d_tile is None:
        d_tile = 512
    d_tile = min(_round_up(d_tile, 128), Dp)
    while Dp % d_tile:          # Dp is a multiple of 128 -> terminates.
        d_tile -= 128
    n_dtiles = Dp // d_tile
    if num_splits is None:
        # 2-way "parallel" split of the reduction so v7x's second TensorCore
        # gets work (partials summed below); collapses for small D.
        num_splits = 2 if n_dtiles % 2 == 0 else 1
    assert n_dtiles % num_splits == 0
    n_dsteps = n_dtiles // num_splits

    block_bytes = (2 * (Bp * d_tile + Np * C0p + Np * Np + C0p * C1p
                        + C1p * d_tile) + 4 * Bp * Np)
    scratch_bytes = (2 * Np * C1p + 4 * Bp * Np
                     + 4 * Np * (C0p + C1p + d_tile))   # f32 intermediates
    flops = 2 * (num_splits * (Np * Np * C0p + Np * C0p * C1p + Np * Np * C1p)
                 + Np * C1p * Dp + Bp * Dp * Np)
    bytes_accessed = (2 * (Bp * Dp + Np * C0p + Np * Np + C0p * C1p + C1p * Dp)
                      + 4 * num_splits * Bp * Np)

    out_parts = pl.pallas_call(
        functools.partial(_gcn_head_kernel, negative_slope=negative_slope,
                          n_dsteps=n_dsteps),
        out_shape=jax.ShapeDtypeStruct((num_splits, Bp, Np), jnp.float32),
        grid_spec=pltpu.PrefetchScalarGridSpec(
            num_scalar_prefetch=0,
            grid=(num_splits, n_dsteps),
            in_specs=[
                pl.BlockSpec((Bp, d_tile),
                             lambda s, j: (0, s * n_dsteps + j)),   # feature
                pl.BlockSpec((Np, C0p), lambda s, j: (0, 0)),       # inp
                pl.BlockSpec((Np, Np), lambda s, j: (0, 0)),        # adj
                pl.BlockSpec((C0p, C1p), lambda s, j: (0, 0)),      # W1
                pl.BlockSpec((C1p, d_tile),
                             lambda s, j: (0, s * n_dsteps + j)),   # W2 tile
            ],
            out_specs=pl.BlockSpec((1, Bp, Np), lambda s, j: (s, 0, 0)),
            scratch_shapes=[
                pltpu.VMEM((Np, C1p), jnp.bfloat16),   # t2 = A @ x1 (reused)
                pltpu.VMEM((Bp, Np), jnp.float32),     # output accumulator
            ],
        ),
        compiler_params=pltpu.CompilerParams(
            dimension_semantics=("parallel", "arbitrary"),
            vmem_limit_bytes=_vmem_limit(block_bytes, scratch_bytes)),
        cost_estimate=pl.CostEstimate(flops=flops, transcendentals=0,
                                      bytes_accessed=bytes_accessed),
    )(featp, inpp, adjp, w1p, w2p)

    out = jnp.sum(out_parts, axis=0)[:B, :N]
    return out.astype(out_dtype)


def init_gcn_params(key, in_features, out_features, bias=False,
                    dtype=jnp.float32):
    """Deterministic init matching GraphConvolution.reset_parameters()."""
    stdv = 1.0 / math.sqrt(out_features)
    kw, kb = jax.random.split(key)
    weight = jax.random.uniform(kw, (in_features, out_features), dtype=dtype,
                                minval=-stdv, maxval=stdv)
    if bias:
        b = jax.random.uniform(kb, (1, 1, out_features), dtype=dtype,
                               minval=-stdv, maxval=stdv)
    else:
        b = None
    return weight, b


if __name__ == "__main__":
    key = jax.random.PRNGKey(0)
    k_inp, k_adj, k_feat, k_g1, k_g2, k_gb = jax.random.split(key, 6)

    # SMALL analog of GCNResnet shapes (real: N=80, C0=300, C1=1024, D=2048).
    B, N = 2, 16
    C0, C1, D = 32, 64, 512

    inp = jax.random.normal(k_inp, (N, C0), dtype=jnp.float32)
    adj_raw = jax.random.uniform(k_adj, (N, N), dtype=jnp.float32)
    adj = adj_raw / jnp.sum(adj_raw, axis=-1, keepdims=True)
    # TODO(synk): `self.features` (external torchvision CNN backbone) is not a
    # Pallas target here; `feature` stands in for its pooled (B, D) output.
    feature = jax.random.normal(k_feat, (B, D), dtype=jnp.float32)

    w1, _ = init_gcn_params(k_g1, C0, C1, bias=False)
    w2, _ = init_gcn_params(k_g2, C1, D, bias=False)
    wb, bb = init_gcn_params(k_gb, C0, C1, bias=True)

    # References replicating the kernels' (A@x)@W association and bf16 cast
    # points (f32 accumulate).
    def ref_gcn(x, a, w, b=None, slope=None):
        bf = lambda v: v.astype(jnp.bfloat16)
        t = jnp.dot(bf(a), bf(x), preferred_element_type=jnp.float32)
        o = jnp.dot(bf(t), bf(w), preferred_element_type=jnp.float32)
        if b is not None:
            o = o + b.reshape(1, -1).astype(jnp.float32)
        if slope is not None:
            o = jnp.where(o >= 0, o, slope * o)
        return o

    def ref_head(feat, x, a, wa, wb_, slope):
        bf = lambda v: v.astype(jnp.bfloat16)
        x1 = ref_gcn(x, a, wa, slope=slope)
        t2 = jnp.dot(bf(a), bf(x1), preferred_element_type=jnp.float32)
        x2 = jnp.dot(bf(t2), bf(wb_), preferred_element_type=jnp.float32)
        return jax.lax.dot_general(
            bf(feat), bf(x2), dimension_numbers=(((1,), (1,)), ((), ())),
            preferred_element_type=jnp.float32)

    # Pure-f32 reference with the ORIGINAL PyTorch association (sanity check).
    def ref_head_f32(feat, x, a, wa, wb_, slope):
        x1 = jnp.dot(a, jnp.dot(x, wa))
        x1 = jnp.where(x1 >= 0, x1, slope * x1)
        x2 = jnp.dot(a, jnp.dot(x1, wb_))
        return jnp.dot(feat, x2.T)

    # 1) standalone GraphConvolution, no bias, fused LeakyReLU (gc1 step).
    out1 = graph_convolution(inp, adj, w1, negative_slope=0.2)
    ref1 = ref_gcn(inp, adj, w1, slope=0.2)

    # 2) standalone GraphConvolution with bias.
    out_b = graph_convolution(inp, adj, wb, bias=bb)
    ref_b = ref_gcn(inp, adj, wb, b=bb)

    # 3) fused head: static operands prepared/cached ONCE, D-tiled + 2-way
    #    parallel split exercised even at small shapes.
    prepared = prepare_gcn_head(inp, adj, w1, w2)
    out_head = gcn_head(feature, prepared, negative_slope=0.2,
                        d_tile=128, num_splits=2)
    ref_h = ref_head(feature, inp, adj, w1, w2, 0.2)
    ref_h32 = ref_head_f32(feature, inp, adj, w1, w2, 0.2)

    jax.block_until_ready((out1, out_b, out_head))

    assert out1.shape == (N, C1)
    assert out_b.shape == (N, C1)
    assert out_head.shape == (B, N)
    assert jnp.allclose(out1, ref1, atol=1e-2, rtol=1e-2)
    assert jnp.allclose(out_b, ref_b, atol=1e-2, rtol=1e-2)
    assert jnp.allclose(out_head, ref_h, atol=1e-2, rtol=1e-2)
    assert jnp.allclose(out_head, ref_h32, atol=5e-2, rtol=5e-2)

    print("KERNEL_OK")
</pallas_src>

<mosaic_0001>
module attributes {stable_mosaic.version = 11 : i64} {
  func.func @_gcn_layer_kernel(%arg0: i32, %arg1: memref<128x128xbf16, #tpu.memory_space<vmem>>, %arg2: memref<128x128xbf16, #tpu.memory_space<vmem>>, %arg3: memref<128x128xbf16, #tpu.memory_space<vmem>>, %arg4: memref<128x128xf32, #tpu.memory_space<vmem>>) attributes {dimension_semantics = [#tpu.dimension_semantics<parallel>], iteration_bounds = array<i64: 1>, scalar_prefetch = 0 : i64, scratch_operands = 0 : i64, tpu.core_type = #tpu.core_type<tc>, window_params = [{pipeline_mode = #tpu.pipeline_mode<synchronous>, transform_indices = @transform_0, window_bounds = array<i64: 128, 128>}, {transform_indices = @transform_1, window_bounds = array<i64: 128, 128>}, {pipeline_mode = #tpu.pipeline_mode<synchronous>, transform_indices = @transform_2, window_bounds = array<i64: 128, 128>}, {transform_indices = @transform_3, window_bounds = array<i64: 128, 128>}]} {
    %c0 = arith.constant 0 : index
    %c0_0 = arith.constant 0 : index
    %0 = vector.load %arg2[%c0, %c0_0] : memref<128x128xbf16, #tpu.memory_space<vmem>>, vector<128x128xbf16>
    %c0_1 = arith.constant 0 : index
    %c0_2 = arith.constant 0 : index
    %1 = vector.load %arg1[%c0_1, %c0_2] : memref<128x128xbf16, #tpu.memory_space<vmem>>, vector<128x128xbf16>
    %cst = arith.constant dense<0.000000e+00> : vector<128x128xf32>
    %2 = tpu.matmul %0, %1, %cst {dimension_numbers = #tpu.dot_dimension_numbers<[1], [0], [0], [1], [0, 0, 1, 1], [], []>} : vector<128x128xbf16>, vector<128x128xbf16>, vector<128x128xf32> -> vector<128x128xf32>
    %3 = arith.truncf %2 : vector<128x128xf32> to vector<128x128xbf16>
    %c0_3 = arith.constant 0 : index
    %c0_4 = arith.constant 0 : index
    %4 = vector.load %arg3[%c0_3, %c0_4] : memref<128x128xbf16, #tpu.memory_space<vmem>>, vector<128x128xbf16>
    %cst_5 = arith.constant dense<0.000000e+00> : vector<128x128xf32>
    %5 = tpu.matmul %3, %4, %cst_5 {dimension_numbers = #tpu.dot_dimension_numbers<[1], [0], [0], [1], [0, 0, 1, 1], [], []>} : vector<128x128xbf16>, vector<128x128xbf16>, vector<128x128xf32> -> vector<128x128xf32>
    %cst_6 = arith.constant 0.000000e+00 : f32
    %6 = vector.broadcast %cst_6 : f32 to vector<128x128xf32>
    %7 = arith.cmpf oge, %5, %6 : vector<128x128xf32>
    %cst_7 = arith.constant 2.000000e-01 : f32
    %8 = vector.broadcast %cst_7 : f32 to vector<128x128xf32>
    %9 = arith.mulf %8, %5 : vector<128x128xf32>
    %10 = arith.select %7, %5, %9 : vector<128x128xi1>, vector<128x128xf32>
    %c0_8 = arith.constant 0 : index
    %c0_9 = arith.constant 0 : index
    %11 = vector.load %arg4[%c0_8, %c0_9] : memref<128x128xf32, #tpu.memory_space<vmem>>, vector<128x128xf32>
    tpu.vector_store %arg4[%c0_8, %c0_9], %10 {strides = array<i32>} : memref<128x128xf32, #tpu.memory_space<vmem>>, vector<128x128xf32>,
    return
  }
  func.func @transform_0(%arg0: i32) -> (i32, i32) {
    %c0_i32 = arith.constant 0 : i32
    %c0_i32_0 = arith.constant 0 : i32
    %c0_i32_1 = arith.constant 0 : i32
    return %c0_i32, %c0_i32_0 : i32, i32
  }
  func.func @transform_1(%arg0: i32) -> (i32, i32) {
    %c0_i32 = arith.constant 0 : i32
    %c0_i32_0 = arith.constant 0 : i32
    return %arg0, %c0_i32 : i32, i32
  }
  func.func @transform_2(%arg0: i32) -> (i32, i32) {
    %c0_i32 = arith.constant 0 : i32
    %c0_i32_0 = arith.constant 0 : i32
    %c0_i32_1 = arith.constant 0 : i32
    return %c0_i32, %c0_i32_0 : i32, i32
  }
  func.func @transform_3(%arg0: i32) -> (i32, i32) {
    %c0_i32 = arith.constant 0 : i32
    %c0_i32_0 = arith.constant 0 : i32
    return %arg0, %c0_i32 : i32, i32
  }
}

</mosaic_0001>

<bundles_post_ra>
// kernel: tpu_custom_call.1
= control target key start
LH: loop header
LB: loop body
LE: loop exit
PB: predicated region body
PF: predicated region fallthrough
CT: control target
= control target key end

     0   :  { %8 = vsyncpa [#allocation3], 0  ;;  %s730_s0 = inlined_call_operand.hbm [shape: bf16[128,128], index: 0, kind: input, shape index: {}]   ;;  %s731_s1 = inlined_call_operand.hbm [shape: bf16[128,128], index: 1, kind: input, shape index: {}]   ;;  %s732_s2 = inlined_call_operand.hbm [shape: bf16[128,128], index: 2, kind: input, shape index: {}]   ;;  %s733_s3 = inlined_call_operand.hbm [shape: f32[128,128], index: 3, kind: output, shape index: {}]  }
   0x1   :  { %9 = vsyncpa [#allocation6], 0 }
   0x2   :  { %10 = vsyncpa [#allocation4], 0  ;;  %s28_s14 = sshll.u32 %s731_s1, 4  ;;  %s690_s15 = smov [#allocation5]   ;;  %s29_s14 = int_to_ptr.hbm [resolvable:$true] %s28_s14 }
   0x3   :  { %s30_s16 = sshll.u32 %s690_s15, 4  ;;  %s15_s19 = sshll.u32 %s730_s0, 4  ;;  %s31_s16 = int_to_ptr.vmem [resolvable:$true] %s30_s16  ;;  %s16_s19 = int_to_ptr.hbm [resolvable:$true] %s15_s19 }
   0x4   :  { %s691_s20 = smov 64   ;;  %s692_s21 = smov 4  }
   0x5   :  { %36 = dma.hbm_to_vmem [thread:$0]  %s29_s14, 1024, %s31_s16, [#allocation6], %s691_s20, %s691_s20, %s692_s21  }
   0x6   :  { %s693_s22 = smov [#allocation2]   ;;  %s41_s26 = sshll.u32 %s732_s2, 4  ;;  %s42_s26 = int_to_ptr.hbm [resolvable:$true] %s41_s26 }
   0x7   :  { %s17_s23 = sshll.u32 %s693_s22, 4  ;;  %s694_s1 = smov [#allocation7]   ;;  %s18_s23 = int_to_ptr.vmem [resolvable:$true] %s17_s23 }
   0x8   :  { %23 = dma.hbm_to_vmem [thread:$0]  %s16_s19, 1024, %s18_s23, [#allocation3], %s691_s20, %s691_s20, %s692_s21  }
   0x9   :  { %s43_s27 = sshll.u32 %s694_s1, 4  ;;  %s44_s27 = int_to_ptr.vmem [resolvable:$true] %s43_s27 }
   0xa   :  { %49 = dma.hbm_to_vmem [thread:$0]  %s42_s26, 1024, %s44_s27, [#allocation6], %s691_s20, %s691_s20, %s692_s21  }
   0xb   :  { %684 = dma.done.wait [#allocation3], 1024  }
   0xc   :  { %685 = vsyncadd [#allocation3], 4294966272 }
   0xd   :  { %686 = dma.done.wait [#allocation6], 2048  }
   0xe   :  { %687 = vsyncadd [#allocation6], 4294965248  ;;  %v555_v0 = vld [vmem:[#allocation2 + $0x38] sm:$0xff]  ;;  %v554_v1 = vld [vmem:[#allocation2 + $0x30] sm:$0xff]  ;;  %s695_s0 = smov [#allocation8]   ;;  %s430_s30 = sshll.u32 %s733_s3, 4  ;;  %s431_s30 = int_to_ptr.hbm [resolvable:$true] %s430_s30 }
   0xf   :  { %190 = vmatpush.bf16.msra.mxu0 %v555_v0  ;;  %564 = vmatpush.bf16.msra.mxu2 %v555_v0  ;;  %v553_v2 = vld [vmem:[#allocation2 + $0x28] sm:$0xff]  ;;  %v552_v3 = vld [vmem:[#allocation2 + $0x20] sm:$0xff]  ;;  %v551_v4 = vld [vmem:[#allocation2 + $0x18] sm:$0xff]  ;;  %s428_s2 = sshll.u32 %s695_s0, 4  ;;  %s696_s4 = smov 128   ;;  %s429_s2 = int_to_ptr.vmem [resolvable:$true] %s428_s2 }
  0x10   :  { %v550_v5 = vld [vmem:[#allocation2 + $0x10] sm:$0xff]  ;;  %v549_v6 = vld [vmem:[#allocation2 + $0x8] sm:$0xff]  ;;  %v548_v7 = vld [vmem:[#allocation2] sm:$0xff]  ;;  %s697_s5 = smov 8  }
  0x11   :  { %v540_v8 = vld [vmem:[#allocation5] sm:$0xff]  ;;  %v541_v10 = vld [vmem:[#allocation5 + $0x8] sm:$0xff]  ;;  %v563_v12 = vld [vmem:[#allocation7 + $0x38] sm:$0xff] }
  0x12   :  { %v544_v9 = vld [vmem:[#allocation5 + $0x20] sm:$0xff]  ;;  %v545_v11 = vld [vmem:[#allocation5 + $0x28] sm:$0xff]  ;;  %311 = vmatpush.bf16.msra.mxu1 %v563_v12  ;;  %v562_v13 = vld [vmem:[#allocation7 + $0x30] sm:$0xff]  ;;  %572 = vmatpush.bf16.msra.mxu3 %v563_v12 }
  0x13   :  { %191 = vmatpush.bf16.msra.mxu0 %v554_v1  ;;  %565 = vmatpush.bf16.msra.mxu2 %v554_v1  ;;  %v561_v14 = vld [vmem:[#allocation7 + $0x28] sm:$0xff]  ;;  %v560_v15 = vld [vmem:[#allocation7 + $0x20] sm:$0xff]  ;;  %v542_v16 = vld [vmem:[#allocation5 + $0x10] sm:$0xff] }
  0x14   :  { %v546_v17 = vld [vmem:[#allocation5 + $0x30] sm:$0xff]  ;;  %v559_v18 = vld [vmem:[#allocation7 + $0x18] sm:$0xff]  ;;  %v557_v22 = vld [vmem:[#allocation7 + $0x8] sm:$0xff] }
  0x15   :  { %v543_v19 = vld [vmem:[#allocation5 + $0x18] sm:$0xff]  ;;  %v558_v21 = vld [vmem:[#allocation7 + $0x10] sm:$0xff]  ;;  %v556_v23 = vld [vmem:[#allocation7] sm:$0xff] }
  0x16   :  { %312 = vmatpush.bf16.msra.mxu1 %v562_v13  ;;  %573 = vmatpush.bf16.msra.mxu3 %v562_v13  ;;  %v547_v20 = vld [vmem:[#allocation5 + $0x38] sm:$0xff] }
  0x17   :  { %192 = vmatpush.bf16.msra.mxu0 %v553_v2  ;;  %566 = vmatpush.bf16.msra.mxu2 %v553_v2 }
  0x1a   :  { %313 = vmatpush.bf16.msra.mxu1 %v561_v14  ;;  %574 = vmatpush.bf16.msra.mxu3 %v561_v14 }
  0x1b   :  { %193 = vmatpush.bf16.msra.mxu0 %v552_v3  ;;  %567 = vmatpush.bf16.msra.mxu2 %v552_v3 }
  0x1e   :  { %314 = vmatpush.bf16.msra.mxu1 %v560_v15  ;;  %575 = vmatpush.bf16.msra.mxu3 %v560_v15 }
  0x1f   :  { %194 = vmatpush.bf16.msra.mxu0 %v551_v4  ;;  %568 = vmatpush.bf16.msra.mxu2 %v551_v4 }
  0x22   :  { %315 = vmatpush.bf16.msra.mxu1 %v559_v18  ;;  %576 = vmatpush.bf16.msra.mxu3 %v559_v18 }
  0x23   :  { %195 = vmatpush.bf16.msra.mxu0 %v550_v5  ;;  %569 = vmatpush.bf16.msra.mxu2 %v550_v5 }
  0x26   :  { %316 = vmatpush.bf16.msra.mxu1 %v558_v21  ;;  %577 = vmatpush.bf16.msra.mxu3 %v558_v21 }
  0x27   :  { %196 = vmatpush.bf16.msra.mxu0 %v549_v6  ;;  %570 = vmatpush.bf16.msra.mxu2 %v549_v6 }
  0x2a   :  { %317 = vmatpush.bf16.msra.mxu1 %v557_v22  ;;  %578 = vmatpush.bf16.msra.mxu3 %v557_v22 }
  0x2b   :  { %197 = vmatpush.bf16.msra.mxu0 %v548_v7  ;;  %571 = vmatpush.bf16.msra.mxu2 %v548_v7 }
  0x2e   :  { %198 = vmatmul.bf16.vlgmr.msra.gmra.mxu0 %v540_v8  ;;  %218 = vmatmul.bf16.vlgmr.msra.gmra.mxu2 %v544_v9 }
  0x2f   :  { %318 = vmatpush.bf16.msra.mxu1 %v556_v23  ;;  %579 = vmatpush.bf16.msra.mxu3 %v556_v23 }
  0x3e   :  { %203 = vmatmul.bf16.gmra.mxu0 %v541_v10  ;;  %223 = vmatmul.bf16.gmra.mxu2 %v545_v11 }
  0x4e   :  { %208 = vmatmul.bf16.gmra.mxu0 %v542_v16  ;;  %228 = vmatmul.bf16.gmra.mxu2 %v546_v17 }
  0x5e   :  { %213 = vmatmul.bf16.gmra.mxu0 %v543_v19  ;;  %233 = vmatmul.bf16.gmra.mxu2 %v547_v20 }
  0xab   :  { %v199_v24 = vpop.f32.mrf.mxu0 }
  0xb1   :  { %v219_v25 = vpop.f32.mrf.mxu2 }
  0xb3   :  { %v201_v26 = vpop.f32.mrf.mxu0 }
  0xb4   :  { %v239_v27 = vpack.c.bf16 %v201_v26, %v199_v24 }
  0xb6   :  { %319 = vmatmul.bf16.vlgmr.msra.gmra.mxu1 %v239_v27 }
  0xb9   :  { %v221_v28 = vpop.f32.mrf.mxu2 }
  0xba   :  { %v243_v29 = vpack.c.bf16 %v221_v28, %v219_v25 }
  0xbb   :  { %v204_v30 = vpop.f32.mrf.mxu0 }
  0xbc   :  { %339 = vmatmul.bf16.vlgmr.msra.gmra.mxu3 %v243_v29 }
  0xc1   :  { %v224_v31 = vpop.f32.mrf.mxu2 }
  0xc3   :  { %v206_v32 = vpop.f32.mrf.mxu0 }
  0xc4   :  { %v240_v33 = vpack.c.bf16 %v206_v32, %v204_v30 }
  0xc6   :  { %324 = vmatmul.bf16.gmra.mxu1 %v240_v33 }
  0xc9   :  { %v226_v34 = vpop.f32.mrf.mxu2 }
  0xca   :  { %v244_v35 = vpack.c.bf16 %v226_v34, %v224_v31 }
  0xcb   :  { %v209_v36 = vpop.f32.mrf.mxu0 }
  0xcc   :  { %344 = vmatmul.bf16.gmra.mxu3 %v244_v35 }
  0xd1   :  { %v229_v37 = vpop.f32.mrf.mxu2 }
  0xd3   :  { %v211_v38 = vpop.f32.mrf.mxu0 }
  0xd4   :  { %v241_v39 = vpack.c.bf16 %v211_v38, %v209_v36 }
  0xd6   :  { %329 = vmatmul.bf16.gmra.mxu1 %v241_v39 }
  0xd9   :  { %v231_v40 = vpop.f32.mrf.mxu2 }
  0xda   :  { %v245_v41 = vpack.c.bf16 %v231_v40, %v229_v37 }
  0xdb   :  { %v214_v42 = vpop.f32.mrf.mxu0 }
  0xdc   :  { %349 = vmatmul.bf16.gmra.mxu3 %v245_v41 }
  0xe1   :  { %v234_v43 = vpop.f32.mrf.mxu2 }
  0xe3   :  { %v216_v44 = vpop.f32.mrf.mxu0 }
  0xe4   :  { %v242_v45 = vpack.c.bf16 %v216_v44, %v214_v42 }
  0xe6   :  { %334 = vmatmul.bf16.gmra.mxu1 %v242_v45 }
  0xe9   :  { %v236_v46 = vpop.f32.mrf.mxu2 }
  0xea   :  { %v246_v47 = vpack.c.bf16 %v236_v46, %v234_v43 }
  0xec   :  { %354 = vmatmul.bf16.gmra.mxu3 %v246_v47 }
 0x133   :  { %v320_v48 = vpop.f32.mrf.mxu1 }
 0x134   :  { %vm360_vm0 = vcmp.ge.f32.partialorder %v320_v48, 0.0  ;;  %v376_v49 = vmul.f32 0.2, %v320_v48 }
 0x136   :  { %v392_v50 = vsel %vm360_vm0, %v320_v48, %v376_v49 }
 0x137   :  { %408 = vst [vmem:[#allocation8] sm:$0xff] %v392_v50 }
 0x13b   :  { %v322_v51 = vpop.f32.mrf.mxu1 }
 0x13c   :  { %vm361_vm1 = vcmp.ge.f32.partialorder %v322_v51, 0.0  ;;  %v377_v52 = vmul.f32 0.2, %v322_v51 }
 0x13e   :  { %v393_v53 = vsel %vm361_vm1, %v322_v51, %v377_v52 }
 0x13f   :  { %409 = vst [vmem:[#allocation8 + $0x8] sm:$0xff] %v393_v53  ;;  %v340_v54 = vpop.f32.mrf.mxu3 }
 0x140   :  { %vm368_vm2 = vcmp.ge.f32.partialorder %v340_v54, 0.0  ;;  %v384_v55 = vmul.f32 0.2, %v340_v54 }
 0x142   :  { %v400_v56 = vsel %vm368_vm2, %v340_v54, %v384_v55 }
 0x143   :  { %416 = vst [vmem:[#allocation8 + $0x40] sm:$0xff] %v400_v56  ;;  %v325_v57 = vpop.f32.mrf.mxu1 }
 0x144   :  { %vm362_vm3 = vcmp.ge.f32.partialorder %v325_v57, 0.0  ;;  %v378_v58 = vmul.f32 0.2, %v325_v57 }
 0x146   :  { %v394_v59 = vsel %vm362_vm3, %v325_v57, %v378_v58 }
 0x147   :  { %410 = vst [vmem:[#allocation8 + $0x10] sm:$0xff] %v394_v59  ;;  %v342_v60 = vpop.f32.mrf.mxu3 }
 0x148   :  { %vm369_vm4 = vcmp.ge.f32.partialorder %v342_v60, 0.0  ;;  %v385_v61 = vmul.f32 0.2, %v342_v60 }
 0x14a   :  { %v401_v62 = vsel %vm369_vm4, %v342_v60, %v385_v61 }
 0x14b   :  { %417 = vst [vmem:[#allocation8 + $0x48] sm:$0xff] %v401_v62  ;;  %v327_v63 = vpop.f32.mrf.mxu1 }
 0x14c   :  { %vm363_vm5 = vcmp.ge.f32.partialorder %v327_v63, 0.0  ;;  %v379_v0 = vmul.f32 0.2, %v327_v63 }
 0x14e   :  { %v395_v1 = vsel %vm363_vm5, %v327_v63, %v379_v0 }
 0x14f   :  { %411 = vst [vmem:[#allocation8 + $0x18] sm:$0xff] %v395_v1  ;;  %v345_v2 = vpop.f32.mrf.mxu3 }
 0x150   :  { %vm370_vm6 = vcmp.ge.f32.partialorder %v345_v2, 0.0  ;;  %v386_v3 = vmul.f32 0.2, %v345_v2 }
 0x152   :  { %v402_v4 = vsel %vm370_vm6, %v345_v2, %v386_v3 }
 0x153   :  { %418 = vst [vmem:[#allocation8 + $0x50] sm:$0xff] %v402_v4  ;;  %v330_v5 = vpop.f32.mrf.mxu1 }
 0x154   :  { %vm364_vm7 = vcmp.ge.f32.partialorder %v330_v5, 0.0  ;;  %v380_v6 = vmul.f32 0.2, %v330_v5 }
 0x156   :  { %v396_v7 = vsel %vm364_vm7, %v330_v5, %v380_v6 }
 0x157   :  { %412 = vst [vmem:[#allocation8 + $0x20] sm:$0xff] %v396_v7  ;;  %v347_v8 = vpop.f32.mrf.mxu3 }
 0x158   :  { %vm371_vm8 = vcmp.ge.f32.partialorder %v347_v8, 0.0  ;;  %v387_v9 = vmul.f32 0.2, %v347_v8 }
 0x15a   :  { %v403_v10 = vsel %vm371_vm8, %v347_v8, %v387_v9 }
 0x15b   :  { %419 = vst [vmem:[#allocation8 + $0x58] sm:$0xff] %v403_v10  ;;  %v332_v11 = vpop.f32.mrf.mxu1 }
 0x15c   :  { %vm365_vm9 = vcmp.ge.f32.partialorder %v332_v11, 0.0  ;;  %v381_v12 = vmul.f32 0.2, %v332_v11 }
 0x15e   :  { %v397_v13 = vsel %vm365_vm9, %v332_v11, %v381_v12 }
 0x15f   :  { %413 = vst [vmem:[#allocation8 + $0x28] sm:$0xff] %v397_v13  ;;  %v350_v14 = vpop.f32.mrf.mxu3 }
 0x160   :  { %vm372_vm10 = vcmp.ge.f32.partialorder %v350_v14, 0.0  ;;  %v388_v15 = vmul.f32 0.2, %v350_v14 }
 0x162   :  { %v404_v16 = vsel %vm372_vm10, %v350_v14, %v388_v15 }
 0x163   :  { %420 = vst [vmem:[#allocation8 + $0x60] sm:$0xff] %v404_v16  ;;  %v335_v17 = vpop.f32.mrf.mxu1 }
 0x164   :  { %vm366_vm11 = vcmp.ge.f32.partialorder %v335_v17, 0.0  ;;  %v382_v18 = vmul.f32 0.2, %v335_v17 }
 0x166   :  { %v398_v19 = vsel %vm366_vm11, %v335_v17, %v382_v18 }
 0x167   :  { %414 = vst [vmem:[#allocation8 + $0x30] sm:$0xff] %v398_v19  ;;  %v352_v20 = vpop.f32.mrf.mxu3 }
 0x168   :  { %vm373_vm12 = vcmp.ge.f32.partialorder %v352_v20, 0.0  ;;  %v389_v21 = vmul.f32 0.2, %v352_v20 }
 0x16a   :  { %v405_v22 = vsel %vm373_vm12, %v352_v20, %v389_v21 }
 0x16b   :  { %421 = vst [vmem:[#allocation8 + $0x68] sm:$0xff] %v405_v22  ;;  %v337_v23 = vpop.f32.mrf.mxu1 }
 0x16c   :  { %vm367_vm13 = vcmp.ge.f32.partialorder %v337_v23, 0.0  ;;  %v383_v24 = vmul.f32 0.2, %v337_v23 }
 0x16e   :  { %v399_v25 = vsel %vm367_vm13, %v337_v23, %v383_v24 }
 0x16f   :  { %415 = vst [vmem:[#allocation8 + $0x38] sm:$0xff] %v399_v25  ;;  %v355_v26 = vpop.f32.mrf.mxu3 }
 0x170   :  { %vm374_vm14 = vcmp.ge.f32.partialorder %v355_v26, 0.0  ;;  %v390_v27 = vmul.f32 0.2, %v355_v26 }
 0x172   :  { %v406_v28 = vsel %vm374_vm14, %v355_v26, %v390_v27 }
 0x173   :  { %422 = vst [vmem:[#allocation8 + $0x70] sm:$0xff] %v406_v28 }
 0x177   :  { %v357_v29 = vpop.f32.mrf.mxu3 }
 0x178   :  { %vm375_vm15 = vcmp.ge.f32.partialorder %v357_v29, 0.0  ;;  %v391_v30 = vmul.f32 0.2, %v357_v29 }
 0x17a   :  { %v407_v31 = vsel %vm375_vm15, %v357_v29, %v391_v30 }
 0x17b   :  { %423 = vst [vmem:[#allocation8 + $0x78] sm:$0xff] %v407_v31 }
 0x17c   :  { %436 = dma.vmem_to_hbm [thread:$0]  %s429_s2, 2048, %s431_s30, [#allocation4], %s696_s4, %s696_s4, %s697_s5  }
 0x17d   :  { %688 = dma.done.wait [#allocation4], 2048  }
 0x17e   :  { %689 = vsyncadd [#allocation4], 4294965248 }
 0x17f   :  { %441 = vsyncpa [#allocation3], 1 }
 0x180   :  { %442 = vsyncpa [#allocation6], 1 }
 0x181   :  { %443 = vsyncpa [#allocation4], 1 }

</bundles_post_ra>
